<compile_context>
chip_gen: v6e
topology: v6e:2x2x1
jax: 0.10.0
libtpu: 0.0.40
codegen_flags: <defaults>
</compile_context>

<pallas_src>
import jax
import jax.numpy as jnp
from jax.experimental import pallas as pl
from jax.experimental.pallas import tpu as pltpu


def identity_kernel(x_ref, out_ref, attn_ref):
    # x_ref / out_ref: (1, S, D)  one batch element — full (S, D) tile so the
    #                  copy runs at the HBM roofline with unmasked vld/vst.
    # attn_ref:        (1, 1, S)  lane-dense ones row (last dim maps to the
    #                  128-lane axis; avoids last-dim-1 masked vst.msk stores).
    out_ref[...] = x_ref[...]
    attn_ref[...] = jnp.ones(attn_ref.shape, dtype=attn_ref.dtype)


def identity_forward(x):
    """x: (B, S, D). Returns (out, attention_weights) matching the PyTorch module."""
    B, S, D = x.shape

    out_shape = (
        jax.ShapeDtypeStruct((B, S, D), x.dtype),      # out = x
        jax.ShapeDtypeStruct((B, 1, S), jnp.float32),  # lane-dense ones, squeezed below
    )

    # Explicit VMEM budget from the actual tiles: double-buffered input + output
    # x tiles plus the tiny attn row, with generous headroom for compiler scratch.
    itemsize = jnp.dtype(x.dtype).itemsize
    x_tile_bytes = S * D * itemsize
    attn_tile_bytes = S * 4
    vmem_limit_bytes = int(2 * (2 * x_tile_bytes + attn_tile_bytes) + (8 << 20))

    grid_spec = pltpu.PrefetchScalarGridSpec(
        num_scalar_prefetch=0,
        grid=(B,),
        in_specs=[
            pl.BlockSpec((1, S, D), lambda b: (b, 0, 0)),   # x, per-batch tile
        ],
        out_specs=[
            pl.BlockSpec((1, S, D), lambda b: (b, 0, 0)),   # out, per-batch tile
            pl.BlockSpec((1, 1, S), lambda b: (b, 0, 0)),   # ones row, lane-dense
        ],
    )

    out, attn = pl.pallas_call(
        identity_kernel,
        out_shape=out_shape,
        grid_spec=grid_spec,
        compiler_params=pltpu.CompilerParams(
            dimension_semantics=("parallel",),   # batches are independent
            vmem_limit_bytes=vmem_limit_bytes,
        ),
    )(x)

    # PyTorch returns attention_weights of shape (B, S); the kernel emits it as
    # a lane-dense (B, 1, S) slab, so drop the middle axis in the wrapper.
    return out, attn.reshape(B, S)


def identity_ref(x):
    """Pure-JAX reference mirroring the PyTorch forward."""
    return x, jnp.ones((x.shape[0], x.shape[1]), dtype=jnp.float32)


if __name__ == "__main__":
    # Small shapes consistent with the module's usage: x is (batch, seq, feature).
    B, S, D = 2, 8, 32

    key = jax.random.PRNGKey(0)
    x = jax.random.normal(key, (B, S, D), dtype=jnp.float32)

    out, attn = identity_forward(x)
    out = jax.block_until_ready(out)
    attn = jax.block_until_ready(attn)

    out_ref, attn_ref = identity_ref(x)
    assert out.shape == (B, S, D) and attn.shape == (B, S)
    assert out.dtype == x.dtype and attn.dtype == jnp.float32
    assert jnp.array_equal(out, out_ref)
    assert jnp.array_equal(attn, attn_ref)

    print("KERNEL_OK")
</pallas_src>

<mosaic_0001>
module attributes {stable_mosaic.version = 11 : i64} {
  func.func @identity_kernel(%arg0: i32, %arg1: memref<1x8x32xf32, #tpu.memory_space<vmem>>, %arg2: memref<1x8x32xf32, #tpu.memory_space<vmem>>, %arg3: memref<1x1x8xf32, #tpu.memory_space<vmem>>) attributes {dimension_semantics = [#tpu.dimension_semantics<parallel>], iteration_bounds = array<i64: 2>, scalar_prefetch = 0 : i64, scratch_operands = 0 : i64, tpu.core_type = #tpu.core_type<tc>, window_params = [{transform_indices = @transform_0, window_bounds = array<i64: 1, 8, 32>}, {transform_indices = @transform_1, window_bounds = array<i64: 1, 8, 32>}, {transform_indices = @transform_2, window_bounds = array<i64: 1, 1, 8>}]} {
    %c0 = arith.constant 0 : index
    %c0_0 = arith.constant 0 : index
    %c0_1 = arith.constant 0 : index
    %0 = vector.load %arg1[%c0, %c0_0, %c0_1] : memref<1x8x32xf32, #tpu.memory_space<vmem>>, vector<1x8x32xf32>
    %c0_2 = arith.constant 0 : index
    %c0_3 = arith.constant 0 : index
    %c0_4 = arith.constant 0 : index
    %1 = vector.load %arg2[%c0_2, %c0_3, %c0_4] : memref<1x8x32xf32, #tpu.memory_space<vmem>>, vector<1x8x32xf32>
    tpu.vector_store %arg2[%c0_2, %c0_3, %c0_4], %0 {strides = array<i32>} : memref<1x8x32xf32, #tpu.memory_space<vmem>>, vector<1x8x32xf32>,
    %cst = arith.constant 1.000000e+00 : f32
    %2 = vector.broadcast %cst : f32 to vector<1x1x8xf32>
    %c0_5 = arith.constant 0 : index
    %c0_6 = arith.constant 0 : index
    %c0_7 = arith.constant 0 : index
    %3 = vector.load %arg3[%c0_5, %c0_6, %c0_7] : memref<1x1x8xf32, #tpu.memory_space<vmem>>, vector<1x1x8xf32>
    tpu.vector_store %arg3[%c0_5, %c0_6, %c0_7], %2 {strides = array<i32>} : memref<1x1x8xf32, #tpu.memory_space<vmem>>, vector<1x1x8xf32>,
    return
  }
  func.func @transform_0(%arg0: i32) -> (i32, i32, i32) {
    %c0_i32 = arith.constant 0 : i32
    %c0_i32_0 = arith.constant 0 : i32
    %c0_i32_1 = arith.constant 0 : i32
    return %arg0, %c0_i32, %c0_i32_0 : i32, i32, i32
  }
  func.func @transform_1(%arg0: i32) -> (i32, i32, i32) {
    %c0_i32 = arith.constant 0 : i32
    %c0_i32_0 = arith.constant 0 : i32
    %c0_i32_1 = arith.constant 0 : i32
    return %arg0, %c0_i32, %c0_i32_0 : i32, i32, i32
  }
  func.func @transform_2(%arg0: i32) -> (i32, i32, i32) {
    %c0_i32 = arith.constant 0 : i32
    %c0_i32_0 = arith.constant 0 : i32
    %c0_i32_1 = arith.constant 0 : i32
    return %arg0, %c0_i32, %c0_i32_0 : i32, i32, i32
  }
}

</mosaic_0001>

<bundles_post_ra>
// kernel: tpu_custom_call.1
= control target key start
LH: loop header
LB: loop body
LE: loop exit
PB: predicated region body
PF: predicated region fallthrough
CT: control target
= control target key end

     0   :  { %8 = vsyncpa [#allocation3], 0  ;;  %s693_s0 = inlined_call_operand.hbm [shape: f32[2,8,32], index: 0, kind: input, shape index: {}]   ;;  %s694_s1 = inlined_call_operand.hbm [shape: f32[2,8,32], index: 1, kind: output, shape index: {0}]   ;;  %s695_s2 = inlined_call_operand.hbm [shape: f32[2,1,8], index: 2, kind: output, shape index: {1}]  }
   0x1   :  { %10 = vsyncpa [#allocation3 + $0x1], 0 }
   0x2   :  { %11 = vsyncpa [#allocation4], 0 }
   0x3   :  { %13 = vsyncpa [#allocation4 + $0x1], 0 }
   0x4   :  { %14 = vsyncpa [#allocation7], 0 }
   0x5   :  { %16 = vsyncpa [#allocation7 + $0x1], 0  ;;  %s511_s9 = smov 0   ;;  %s513_s10 = smov 0  }
   0x6   :  { %s515_s11 = smov 0   ;;  %s517_s12 = smov 0  }
   0x7 LB: > { %s532_s13 = sadd.s32 4294967295, %s490_s12   ;;  %s303_s14 = sadd.s32 4294967294, %s490_s12   ;;  %s490_s12 = sphi %s517_s12, %s712_s12   ;;  %s486_s11 = sphi %s515_s11, %s711_s11   ;;  %s482_s10 = sphi %s513_s10, %s710_s10   ;;  %s478_s9 = sphi %s511_s9, %s709_s9  }
   0x8   : > { %s536_s15 = sadd.s32 1, %s490_s12   ;;  %s29_s16 = sadd.s32 1, %s486_s11 }
   0x9   : > { %s26_s17 = ssub.s32 %s490_s12, %s536_s15  ;;  %p36_p0 = scmp.ne.s32.totalorder %s486_s11, %s482_s10 }
   0xa   : > { %p27_p1 = scmp.eq.s32.totalorder %s26_s17, 0  ;;  %p37_p2 = scmp.eq.s32.totalorder %s490_s12, 0 }
   0xb   : > { %p42_p3 = scmp.ne.s32.totalorder %s482_s10, %s478_s9  ;;  %p43_p4 = scmp.eq.s32.totalorder %s532_s13, 0 }
   0xc   : > { %s548_s18 = scalar_select %p27_p1, %s486_s11, %s29_s16  }
   0xd   : > { %p550_p5 = por %p37_p2, %p36_p0  ;;  %p554_p6 = por %p43_p4, %p42_p3 }
   0xe   : > { %p66_p7 = scmp.eq.s32.totalorder %s532_s13, 1  ;;  %p72_p8 = scmp.eq.s32.totalorder %s303_s14, 1 }
   0xf   : > { %s699_s20 = scalar_select %p554_p6, 1, 0 }
  0x10   : > { %p333_p10 = scmp.lt.s32.totalorder %s490_s12, 2  ;;  %p561_p11 = por %p66_p7, %p36_p0 }
  0x11   : > { %p565_p12 = por %p72_p8, %p42_p3  ;;  %s118_s23 = sand.u32 1, %s486_s11  }
  0x12   : > { %s700_s21 = scalar_select %p561_p11, 1, 0 }
  0x13   : > { %s701_s22 = scalar_select %p565_p12, 1, 0 }
  0x14   : > { %s307_s24 = sshll.u32 %s490_s12, 7  ;;  %s306_s25 = sshll.u32 %s118_s23, 3 }
  0x15   : > { %s574_s28 = scalar_lea.hbm %s693_s0, %s307_s24  ;;  %s122_s29 = scalar_lea.vmem [#allocation2], %s306_s25 }
  0x16   : > { %s129_s30 = sshll.u32 %s122_s29, 4  ;;  %p578_p13 = pnand %p333_p10, %p550_p5  ;;  %s582_s30 = int_to_ptr.vmem [resolvable:$true] %s129_s30 }
  0x17   : > { %s119_s4 = scalar_lea.sflag [#allocation3], %s118_s23  ;;  %s368_s5 = scalar_lea.hbm %s574_s28, 128 }
  0x18   : > { %p369_p2 = scmp.ne.s32.totalorder %s574_s28, %s368_s5  ;;  %p370_p3 = pneg %p578_p13 }
  0x19   : > { %s373_s8 = scalar_lea.hbm %s693_s0, 256  ;;  %p374_p5 = scmp.lt.s32.totalorder %s574_s28, %s693_s0 }
  0x1a   : > { %p371_p4 = pnand %p370_p3, %p369_p2  ;;  %p375_p8 = scmp.lt.s32.totalorder %s373_s8, %s368_s5 }
  0x1c   : > { %p372_p7 = pneg %p371_p4  ;;  %p376_p10 = por %p375_p8, %p374_p5 }
  0x1e   : > { %p377_p9 = pnand %p376_p10, %p372_p7 }
  0x20   : > { %380 = shalt.err (!%p377_p9)
}
  0x21   : > { %s381_s17 = scalar_lea.vmem %s582_s30, 128  ;;  %s492_s19 = smov [#allocation2]  }
  0x22   : > { %p382_p0 = scmp.ne.s32.totalorder %s582_s30, %s381_s17  ;;  %s386_s23 = sshll.u32 %s492_s19, 4  ;;  %s387_s23 = int_to_ptr.vmem [resolvable:$false] %s386_s23 }
  0x23   : > { %s388_s24 = scalar_lea.vmem %s387_s23, 256  ;;  %p389_p4 = scmp.lt.s32.totalorder %s582_s30, %s387_s23 }
  0x24   : > { %p384_p1 = pnand %p382_p0, %p370_p3  ;;  %p390_p12 = scmp.lt.s32.totalorder %s388_s24, %s381_s17 }
  0x26   : > { %p385_p2 = pneg %p384_p1  ;;  %p391_p11 = por %p390_p12, %p389_p4 }
  0x28   : > { %p392_p6 = pnand %p391_p11, %p385_p2 }
  0x2a   : > { %395 = shalt.err (!%p392_p6)
}
  0x2b   : > { %325 = dma.hbm_to_vmem [thread:$0]  (!%p578_p13), %s574_s28, 128, %s582_s30, %s119_s4  }
  0x2c   : > { %p703_p9 = scmp.lt.s32.totalorder %s490_s12, 3  ;;  %p704_p7 = scmp.ge.s32.totalorder %s490_s12, 1 }
  0x2e   : > { %p135_p0 = pnand %p704_p7, %p703_p9 }
  0x2f   : > { %s609_s25 = sand.u32 (!%p135_p0), 1, %s482_s10   ;;  %p705_p6 = scmp.ne.s32.totalorder (!%p135_p0), %s699_s20, 0 }
  0x30   : > { %138 = sbr.rel (%p135_p0) target bundleno = 103 (0x67), region = 24  ;;  %s309_s26 = sshll.u32 (!%p135_p0), %s609_s25, 3 }
  0x31   : > { %s141_s27 = scalar_lea.sflag (!%p135_p0), [#allocation3], %s609_s25  ;;  %s144_s29 = scalar_lea.vmem (!%p135_p0), [#allocation2], %s309_s26 }
  0x35   : > { %465 = dma.done.wait (%p705_p6), %s141_s27, 128  }
  0x36   : > { %467 = vsyncadd (%p705_p6), %s141_s27, 4294967168  ;;  %vm172_vm0 = vcmask 57344   ;;  %s617_s28 = scalar_lea.vmem [#allocation5], %s309_s26  ;;  %s168_s3 = scalar_lea.vmem [#allocation6], %s609_s25  ;;  %v493_v0 = vmov 1.0   ;;  %vm170_vm1 = vcmask 261120  }
  0x37   : > { %s192_s30 = sshll.u32 %s617_s28, 4  ;;  %173 = vst.msk [vmem:[%s168_s3] sm:$0x1] %vm172_vm0, %v493_v0  ;;  %s205_s4 = sshll.u32 %s168_s3, 4  ;;  %v169_v1 = vld [vmem:[%s144_s29] sm:$0xff]  ;;  %s621_s30 = int_to_ptr.vmem [resolvable:$true] %s192_s30  ;;  %s624_s4 = int_to_ptr.vmem [resolvable:$true] %s205_s4 }
  0x38   : > { %s312_s5 = sshll.u32 %s532_s13, 7  ;;  %s313_s20 = sshll.u32 %s532_s13, 4 }
  0x39   : > { %s630_s8 = scalar_lea.hbm %s694_s1, %s312_s5  ;;  %s203_s17 = scalar_lea.hbm %s695_s2, %s313_s20 }
  0x3a   : > { %s180_s19 = scalar_lea.sflag [#allocation7], %s609_s25  ;;  %s396_s23 = scalar_lea.vmem %s624_s4, 16 }
  0x3b   : > { %p397_p11 = scmp.ne.s32.totalorder %s624_s4, %s396_s23  ;;  %p706_p12 = scmp.ne.s32.totalorder %s700_s21, 0 }
  0x3c   : > { %s494_s24 = smov [#allocation6]  }
  0x3d   : > { %p398_p13 = pnand %p397_p11, %p706_p12  ;;  %s400_s26 = sshll.u32 %s494_s24, 4  ;;  %s401_s26 = int_to_ptr.vmem [resolvable:$false] %s400_s26 }
  0x3e   : > { %s402_s13 = scalar_lea.vmem %s401_s26, 32  ;;  %p403_p3 = scmp.lt.s32.totalorder %s624_s4, %s401_s26 }
  0x3f   : > { %p399_p1 = pneg %p398_p13  ;;  %p404_p5 = scmp.lt.s32.totalorder %s402_s13, %s396_s23 }
  0x41   : > { %p405_p8 = por %p404_p5, %p403_p3 }
  0x43   : > { %p406_p10 = pnand %p405_p8, %p399_p1 }
  0x45   : > { %409 = shalt.err (!%p406_p10)
}
  0x46   : > { %s410_s27 = scalar_lea.hbm %s203_s17, 16  ;;  %s414_s5 = scalar_lea.hbm %s695_s2, 32 }
  0x47   : > { %p411_p2 = scmp.ne.s32.totalorder %s203_s17, %s410_s27  ;;  %p415_p7 = scmp.lt.s32.totalorder %s203_s17, %s695_s2 }
  0x48   : > { %p416_p0 = scmp.lt.s32.totalorder %s414_s5, %s410_s27 }
  0x49   : > { %p412_p4 = pnand %p411_p2, %p706_p12 }
  0x4a   : > { %p417_p6 = por %p416_p0, %p415_p7 }
  0x4b   : > { %p413_p9 = pneg %p412_p4 }
  0x4d   : > { %p418_p11 = pnand %p417_p6, %p413_p9 }
  0x4f   : > { %421 = shalt.err (!%p418_p11)
}
  0x50   : > { %319 = dma.vmem_to_hbm [thread:$0]  (%p706_p12), %s624_s4, 16, %s203_s17, %s180_s19   ;;  %171 = vst.msk [vmem:[%s617_s28] sm:$0xff] %vm170_vm1, %v169_v1 }
  0x51   : > { %s175_s7 = scalar_lea.sflag [#allocation4], %s609_s25  ;;  %s422_s14 = scalar_lea.vmem %s621_s30, 128 }
  0x52   : > { %p423_p13 = scmp.ne.s32.totalorder %s621_s30, %s422_s14  ;;  %s495_s16 = smov [#allocation5]  }
  0x53   : > { %s426_s23 = sshll.u32 %s495_s16, 4  ;;  %s427_s23 = int_to_ptr.vmem [resolvable:$false] %s426_s23 }
  0x54   : > { %p424_p1 = pnand %p423_p13, %p706_p12  ;;  %s428_s24 = scalar_lea.vmem %s427_s23, 256 }
  0x55   : > { %p429_p5 = scmp.lt.s32.totalorder %s621_s30, %s427_s23  ;;  %p430_p8 = scmp.lt.s32.totalorder %s428_s24, %s422_s14 }
  0x56   : > { %p425_p3 = pneg %p424_p1 }
  0x57   : > { %p431_p10 = por %p430_p8, %p429_p5 }
  0x59   : > { %p432_p2 = pnand %p431_p10, %p425_p3 }
  0x5b   : > { %435 = shalt.err (!%p432_p2)
}
  0x5c   : > { %s436_s28 = scalar_lea.hbm %s630_s8, 128  ;;  %s440_s17 = scalar_lea.hbm %s694_s1, 256 }
  0x5d   : > { %p437_p4 = scmp.ne.s32.totalorder %s630_s8, %s436_s28  ;;  %p441_p0 = scmp.lt.s32.totalorder %s630_s8, %s694_s1 }
  0x5e   : > { %p442_p6 = scmp.lt.s32.totalorder %s440_s17, %s436_s28 }
  0x5f   : > { %p438_p9 = pnand %p437_p4, %p706_p12 }
  0x60   : > { %p443_p11 = por %p442_p6, %p441_p0 }
  0x61   : > { %p439_p7 = pneg %p438_p9 }
  0x63   : > { %p444_p13 = pnand %p443_p11, %p439_p7 }
  0x65   : > { %447 = shalt.err (!%p444_p13)
}
  0x66   : > { %318 = dma.vmem_to_hbm [thread:$0]  (%p706_p12), %s621_s30, 128, %s630_s8, %s175_s7  }
  0x67 PF: > { %s217_s13 = sand.u32 1, %s478_s9   ;;  %p707_p1 = scmp.ne.s32.totalorder %s701_s22, 0 }
  0x68   : > { %p708_p3 = scmp.ge.s32.totalorder %s490_s12, 2  ;;  %s218_s27 = scalar_lea.sflag [#allocation4], %s217_s13 }
  0x6a   : > { %p327_p5 = pnand %p708_p3, %p707_p1 }
  0x6c   : > { %p328_p8 = pneg %p327_p5 }
  0x6e   : > { %469 = dma.done.wait (%p328_p8), %s218_s27, 128  }
  0x6f   : > { %471 = vsyncadd (%p328_p8), %s218_s27, 4294967168  ;;  %s227_s29 = scalar_lea.sflag [#allocation7], %s217_s13 }
  0x70   : > { %473 = dma.done.wait (%p328_p8), %s227_s29, 16  }
  0x71   : > { %475 = vsyncadd (%p328_p8), %s227_s29, 4294967280  ;;  %p19_p12 = scmp.ge.s32.totalorder %s536_s15, 4   ;;  %s709_s9 = smov %s482_s10 }
  0x72   : > { %s710_s10 = smov %s486_s11  ;;  %s711_s11 = smov %s548_s18 }
  0x73   : > { %s712_s12 = smov %s536_s15  ;;  %21 = sbr.rel (!%p19_p12) target bundleno = 7 (0x7), region = 86 }
  0x78   :  { %231 = vsyncpa [#allocation3], 1 }
  0x79   :  { %233 = vsyncpa [#allocation3 + $0x1], 1 }
  0x7a   :  { %234 = vsyncpa [#allocation4], 1 }
  0x7b   :  { %236 = vsyncpa [#allocation4 + $0x1], 1 }
  0x7c   :  { %237 = vsyncpa [#allocation7], 1 }
  0x7d   :  { %239 = vsyncpa [#allocation7 + $0x1], 1 }

</bundles_post_ra>
